<compile_context>
chip_gen: v5e
topology: v5e:2x2
jax: 0.10.0
libtpu: 0.0.40
codegen_flags: <defaults>
</compile_context>

<pallas_src>
import functools

import jax
import jax.numpy as jnp
from jax import lax
from jax.experimental import pallas as pl
from jax.experimental.pallas import tpu as pltpu


_LANE = 128


# ----------------------------- in-kernel helpers ------------------------------

def _softplus(x):
    # Numerically stable softplus: log(1 + exp(x)) without overflow / -inf.
    return jnp.maximum(x, 0.0) + jnp.log(1.0 + jnp.exp(-jnp.abs(x)))


def _dot_t(w, a_bm, compute_dtype):
    """(out, in) @ (tb, in)[batch-major] -> (out, tb), contract feature axis.

    Keeps the result feature-major (batch on lanes) without any HBM-side
    transpose of the activation; accumulation is always f32.
    """
    return lax.dot_general(
        w.astype(compute_dtype), a_bm.astype(compute_dtype),
        dimension_numbers=(((1,), (1,)), ((), ())),
        preferred_element_type=jnp.float32)


def _dot_f(w, a_fm, compute_dtype):
    """(out, in) @ (in, tb)[feature-major] -> (out, tb)."""
    return jnp.dot(w.astype(compute_dtype), a_fm.astype(compute_dtype),
                   preferred_element_type=jnp.float32)


def _unpack_cols(cols, H, D):
    """Split the packed (P, 8) f32 parameter buffer into the 5 column params."""
    gb1 = cols[0:H, 0:1]
    gb2 = cols[0:D, 1:2]
    db1 = cols[0:H, 2:3]
    dw2 = cols[0:H, 3:4]
    db2 = cols[0:1, 4:5]
    return gb1, gb2, db1, dw2, db2


# --------------------------------- kernels -----------------------------------

def _disc_train_kernel(compute_dtype, x_ref, z_ref, gw1_ref, gw2_ref, dw1_ref,
                       cols_ref, loss_ref):
    """loss[1, tb] = -log(D(x)) - log(1 - D(G(z))) computed in logit space."""
    H = gw1_ref.shape[0]
    D = gw2_ref.shape[0]

    x = x_ref[...]                        # (tb, D)  batch-major
    z = z_ref[...]                        # (tb, Z)  batch-major
    gw1 = gw1_ref[...]                    # (H, Z)
    gw2 = gw2_ref[...]                    # (D, H)
    dw1 = dw1_ref[...]                    # (H, D)
    gb1, gb2, db1, dw2, db2 = _unpack_cols(cols_ref[...], H, D)

    # Generator: z -> fake, feature-major (D, tb).
    h1 = jnp.maximum(_dot_t(gw1, z, compute_dtype) + gb1, 0.0)         # (H, tb)
    fake_t = jnp.tanh(_dot_f(gw2, h1, compute_dtype) + gb2)            # (D, tb)

    # Discriminator on real x (contract over x's feature axis directly).
    hr = jnp.maximum(_dot_t(dw1, x, compute_dtype) + db1, 0.0)         # (H, tb)
    logit_real = jnp.sum(hr * dw2, axis=0, keepdims=True) + db2        # (1, tb)

    # Discriminator on fake (already feature-major).
    hf = jnp.maximum(_dot_f(dw1, fake_t, compute_dtype) + db1, 0.0)    # (H, tb)
    logit_fake = jnp.sum(hf * dw2, axis=0, keepdims=True) + db2        # (1, tb)

    # -log(sigmoid(l)) = softplus(-l);  -log(1 - sigmoid(l)) = softplus(l)
    loss_ref[...] = _softplus(-logit_real) + _softplus(logit_fake)


def _gen_train_kernel(compute_dtype, z_ref, gw1_ref, gw2_ref, dw1_ref,
                      cols_ref, loss_ref):
    """loss[1, tb] = -log(D(G(z))) computed in logit space."""
    H = gw1_ref.shape[0]
    D = gw2_ref.shape[0]

    z = z_ref[...]
    gw1 = gw1_ref[...]
    gw2 = gw2_ref[...]
    dw1 = dw1_ref[...]
    gb1, gb2, db1, dw2, db2 = _unpack_cols(cols_ref[...], H, D)

    h1 = jnp.maximum(_dot_t(gw1, z, compute_dtype) + gb1, 0.0)
    fake_t = jnp.tanh(_dot_f(gw2, h1, compute_dtype) + gb2)
    hf = jnp.maximum(_dot_f(dw1, fake_t, compute_dtype) + db1, 0.0)
    logit_fake = jnp.sum(hf * dw2, axis=0, keepdims=True) + db2

    loss_ref[...] = _softplus(-logit_fake)


# --------------------------------- wrapper -----------------------------------

def _plan_tiles(batch, cap=1024, lane=_LANE):
    """Pick (padded_batch, tile_b, num_tiles).

    * tiles are lane-dense (multiples of 128) once batch > 128,
    * tile_b capped at `cap` (per-step VMEM stays tiny, per-step overhead
      amortized, DMAs near roofline),
    * >=2 tiles whenever batch >= 256 so the single "parallel" grid axis can
      shard across v7x's two TensorCores.
    """
    if batch <= lane:
        return batch, batch, 1
    nblk = -(-batch // lane)                       # lane blocks needed
    tb_blk = min(cap // lane, nblk)
    if nblk >= 2 and tb_blk >= nblk and batch >= 2 * lane:
        tb_blk = (nblk + 1) // 2                   # force >=2 parallel tiles
    tile_b = tb_blk * lane
    padded = -(-(nblk * lane) // tile_b) * tile_b  # padded batch, multiple of tile_b
    return padded, tile_b, padded // tile_b


class GANPallas:
    DISC_TRAIN = 1
    GEN_TRAIN = 2

    def __init__(self, params, gan_mode=None, tile_b=None,
                 compute_dtype=jnp.bfloat16):
        self._gan_mode = gan_mode
        self.tile_b = tile_b
        self.compute_dtype = compute_dtype

        f32 = jnp.float32
        gw1 = jnp.asarray(params["gw1"], f32)   # (Z, H)
        gw2 = jnp.asarray(params["gw2"], f32)   # (H, D)
        dw1 = jnp.asarray(params["dw1"], f32)   # (D, H)
        Z, H = gw1.shape
        _, D = gw2.shape
        self.Z, self.H, self.D = Z, H, D

        # Weight matrices: feature-major ("output-major") + MXU dtype, once.
        self._weights = [
            gw1.T.astype(compute_dtype),        # (H, Z)
            gw2.T.astype(compute_dtype),        # (D, H)
            dw1.T.astype(compute_dtype),        # (H, D)
        ]

        # Pack the 5 lane-width-1 params into one (P, 8) f32 buffer (1 DMA).
        P = ((max(H, D) + 7) // 8) * 8
        cols = jnp.zeros((P, 8), f32)
        cols = cols.at[0:H, 0].set(jnp.asarray(params["gb1"], f32).reshape(H))
        cols = cols.at[0:D, 1].set(jnp.asarray(params["gb2"], f32).reshape(D))
        cols = cols.at[0:H, 2].set(jnp.asarray(params["db1"], f32).reshape(H))
        cols = cols.at[0:H, 3].set(jnp.asarray(params["dw2"], f32).reshape(H))
        cols = cols.at[0:1, 4].set(jnp.asarray(params["db2"], f32).reshape(1))
        self._cols = cols

    # --- mode switches (match the PyTorch API) ---
    def disc_train(self):
        self._gan_mode = self.DISC_TRAIN
        return self

    def gen_train(self):
        self._gan_mode = self.GEN_TRAIN
        return self

    # --- internals ---
    def _tiles_for(self, B):
        if self.tile_b is not None:
            tb = self.tile_b
            padded = -(-B // tb) * tb
            return padded, tb, padded // tb
        return _plan_tiles(B)

    @staticmethod
    def _pad_batch(a, padded):
        B = a.shape[0]
        if padded == B:
            return a
        return jnp.pad(a, ((0, padded - B), (0, 0)))

    def _param_specs(self):
        gw1, gw2, dw1 = self._weights
        return [
            pl.BlockSpec(gw1.shape, lambda i: (0, 0)),
            pl.BlockSpec(gw2.shape, lambda i: (0, 0)),
            pl.BlockSpec(dw1.shape, lambda i: (0, 0)),
            pl.BlockSpec(self._cols.shape, lambda i: (0, 0)),
        ]

    # --- forward passes ---
    def forward_disc_train(self, x, z):
        B, D = x.shape
        _, Z = z.shape
        assert D == self.D and Z == self.Z
        padded, tb, ntiles = self._tiles_for(B)
        x_in = self._pad_batch(x, padded)
        z_in = self._pad_batch(z, padded)
        gw1, gw2, dw1 = self._weights

        cost = pl.CostEstimate(
            flops=2 * padded * (self.Z * self.H + 3 * self.D * self.H),
            transcendentals=padded * (self.D + 4),
            bytes_accessed=4 * padded * (self.D + self.Z + 1))

        f = pl.pallas_call(
            functools.partial(_disc_train_kernel, self.compute_dtype),
            out_shape=jax.ShapeDtypeStruct((1, padded), jnp.float32),
            grid=(ntiles,),
            in_specs=[pl.BlockSpec((tb, self.D), lambda i: (i, 0)),
                      pl.BlockSpec((tb, self.Z), lambda i: (i, 0))]
                     + self._param_specs(),
            out_specs=pl.BlockSpec((1, tb), lambda i: (0, i)),
            compiler_params=pltpu.CompilerParams(
                dimension_semantics=("parallel",)),
            cost_estimate=cost,
        )
        loss_row = f(x_in, z_in, gw1, gw2, dw1, self._cols)   # (1, padded)
        return loss_row[0, :B].reshape(B, 1)

    def forward_gen_train(self, z):
        B, Z = z.shape
        assert Z == self.Z
        padded, tb, ntiles = self._tiles_for(B)
        z_in = self._pad_batch(z, padded)
        gw1, gw2, dw1 = self._weights

        cost = pl.CostEstimate(
            flops=2 * padded * (self.Z * self.H + 2 * self.D * self.H),
            transcendentals=padded * (self.D + 2),
            bytes_accessed=4 * padded * (self.Z + 1))

        f = pl.pallas_call(
            functools.partial(_gen_train_kernel, self.compute_dtype),
            out_shape=jax.ShapeDtypeStruct((1, padded), jnp.float32),
            grid=(ntiles,),
            in_specs=[pl.BlockSpec((tb, self.Z), lambda i: (i, 0))]
                     + self._param_specs(),
            out_specs=pl.BlockSpec((1, tb), lambda i: (0, i)),
            compiler_params=pltpu.CompilerParams(
                dimension_semantics=("parallel",)),
            cost_estimate=cost,
        )
        loss_row = f(z_in, gw1, gw2, dw1, self._cols)
        return loss_row[0, :B].reshape(B, 1)

    def __call__(self, *x):
        if self._gan_mode == self.DISC_TRAIN:
            return self.forward_disc_train(*x)
        elif self._gan_mode == self.GEN_TRAIN:
            return self.forward_gen_train(*x)
        else:
            # TODO(synk): GAN.generate(1) is not defined in the reference module; no equivalent implemented.
            raise NotImplementedError("gan_mode must be DISC_TRAIN or GEN_TRAIN")


# ------------------------------ reference (JAX) -------------------------------
# Faithful, batch-major translation of the PyTorch forward (sigmoid -> log).

def _ref_gen(z, p):
    h = jnp.maximum(z @ p["gw1"] + p["gb1"], 0.0)
    return jnp.tanh(h @ p["gw2"] + p["gb2"])


def _ref_disc(x, p):
    h = jnp.maximum(x @ p["dw1"] + p["db1"], 0.0)
    return jax.nn.sigmoid(h @ p["dw2"] + p["db2"])


def _ref_disc_train(x, z, p):
    rs = _ref_disc(x, p)
    fs = _ref_disc(_ref_gen(z, p), p)
    return -jnp.log(rs) - jnp.log(1.0 - fs)


def _ref_gen_train(z, p):
    return -jnp.log(_ref_disc(_ref_gen(z, p), p))


# ---------------------------------- main --------------------------------------

if __name__ == "__main__":
    Z, H, D = 32, 64, 128   # latent, hidden, data dims

    key = jax.random.PRNGKey(0)
    ks = jax.random.split(key, 8)
    params = {
        "gw1": 0.1 * jax.random.normal(ks[0], (Z, H), jnp.float32),
        "gb1": jnp.zeros((1, H), jnp.float32),
        "gw2": 0.1 * jax.random.normal(ks[1], (H, D), jnp.float32),
        "gb2": jnp.zeros((1, D), jnp.float32),
        "dw1": 0.1 * jax.random.normal(ks[2], (D, H), jnp.float32),
        "db1": jnp.zeros((1, H), jnp.float32),
        "dw2": 0.1 * jax.random.normal(ks[3], (H, 1), jnp.float32),
        "db2": jnp.zeros((1, 1), jnp.float32),
    }

    # ---- small batch, f32 matmuls (exact check, single full-array tile) ----
    B = 16
    x = jax.random.normal(ks[4], (B, D), jnp.float32)   # "real" data
    z = jax.random.normal(ks[5], (B, Z), jnp.float32)   # latent noise

    gan_f32 = GANPallas(params, compute_dtype=jnp.float32)

    loss_d = jax.block_until_ready(gan_f32.disc_train()(x, z))
    assert loss_d.shape == (B, 1)
    ref_d = _ref_disc_train(x, z, params)
    assert jnp.allclose(loss_d, ref_d, atol=1e-3, rtol=1e-3), (
        float(jnp.max(jnp.abs(loss_d - ref_d))))

    loss_g = jax.block_until_ready(gan_f32.gen_train()(z))
    assert loss_g.shape == (B, 1)
    ref_g = _ref_gen_train(z, params)
    assert jnp.allclose(loss_g, ref_g, atol=1e-3, rtol=1e-3), (
        float(jnp.max(jnp.abs(loss_g - ref_g))))

    # ---- larger awkward batch: exercises padding, lane-dense tiles, a
    #      2-step parallel grid and the default bf16 MXU-operand path ----
    B2 = 300
    x2 = jax.random.normal(ks[6], (B2, D), jnp.float32)
    z2 = jax.random.normal(ks[7], (B2, Z), jnp.float32)

    gan_bf16 = GANPallas(params)   # compute_dtype=bfloat16 (default)

    loss_d2 = jax.block_until_ready(gan_bf16.disc_train()(x2, z2))
    assert loss_d2.shape == (B2, 1)
    ref_d2 = _ref_disc_train(x2, z2, params)
    assert jnp.allclose(loss_d2, ref_d2, atol=5e-2, rtol=5e-2), (
        float(jnp.max(jnp.abs(loss_d2 - ref_d2))))

    loss_g2 = jax.block_until_ready(gan_bf16.gen_train()(z2))
    assert loss_g2.shape == (B2, 1)
    ref_g2 = _ref_gen_train(z2, params)
    assert jnp.allclose(loss_g2, ref_g2, atol=5e-2, rtol=5e-2), (
        float(jnp.max(jnp.abs(loss_g2 - ref_g2))))

    print("KERNEL_OK")
</pallas_src>

<mosaic_0001>
module attributes {stable_mosaic.version = 11 : i64} {
  func.func @_disc_train_kernel(%arg0: i32, %arg1: memref<16x128xf32, #tpu.memory_space<vmem>>, %arg2: memref<16x32xf32, #tpu.memory_space<vmem>>, %arg3: memref<64x32xf32, #tpu.memory_space<vmem>>, %arg4: memref<128x64xf32, #tpu.memory_space<vmem>>, %arg5: memref<64x128xf32, #tpu.memory_space<vmem>>, %arg6: memref<128x8xf32, #tpu.memory_space<vmem>>, %arg7: memref<1x16xf32, #tpu.memory_space<vmem>>) attributes {dimension_semantics = [#tpu.dimension_semantics<parallel>], iteration_bounds = array<i64: 1>, scalar_prefetch = 0 : i64, scratch_operands = 0 : i64, tpu.core_type = #tpu.core_type<tc>, window_params = [{transform_indices = @transform_0, window_bounds = array<i64: 16, 128>}, {transform_indices = @transform_1, window_bounds = array<i64: 16, 32>}, {pipeline_mode = #tpu.pipeline_mode<synchronous>, transform_indices = @transform_2, window_bounds = array<i64: 64, 32>}, {pipeline_mode = #tpu.pipeline_mode<synchronous>, transform_indices = @transform_3, window_bounds = array<i64: 128, 64>}, {pipeline_mode = #tpu.pipeline_mode<synchronous>, transform_indices = @transform_4, window_bounds = array<i64: 64, 128>}, {pipeline_mode = #tpu.pipeline_mode<synchronous>, transform_indices = @transform_5, window_bounds = array<i64: 128, 8>}, {transform_indices = @transform_6, window_bounds = array<i64: 1, 16>}]} {
    %c0 = arith.constant 0 : index
    %c0_0 = arith.constant 0 : index
    %0 = vector.load %arg1[%c0, %c0_0] : memref<16x128xf32, #tpu.memory_space<vmem>>, vector<16x128xf32>
    %c0_1 = arith.constant 0 : index
    %c0_2 = arith.constant 0 : index
    %1 = vector.load %arg2[%c0_1, %c0_2] : memref<16x32xf32, #tpu.memory_space<vmem>>, vector<16x32xf32>
    %c0_3 = arith.constant 0 : index
    %c0_4 = arith.constant 0 : index
    %2 = vector.load %arg3[%c0_3, %c0_4] : memref<64x32xf32, #tpu.memory_space<vmem>>, vector<64x32xf32>
    %c0_5 = arith.constant 0 : index
    %c0_6 = arith.constant 0 : index
    %3 = vector.load %arg4[%c0_5, %c0_6] : memref<128x64xf32, #tpu.memory_space<vmem>>, vector<128x64xf32>
    %c0_7 = arith.constant 0 : index
    %c0_8 = arith.constant 0 : index
    %4 = vector.load %arg5[%c0_7, %c0_8] : memref<64x128xf32, #tpu.memory_space<vmem>>, vector<64x128xf32>
    %c0_9 = arith.constant 0 : index
    %c0_10 = arith.constant 0 : index
    %5 = vector.load %arg6[%c0_9, %c0_10] : memref<128x8xf32, #tpu.memory_space<vmem>>, vector<128x8xf32>
    %6 = vector.extract_strided_slice %5 {offsets = [0, 0], sizes = [64, 1], strides = [1, 1]} : vector<128x8xf32> to vector<64x1xf32>
    %7 = vector.extract_strided_slice %5 {offsets = [0, 1], sizes = [128, 1], strides = [1, 1]} : vector<128x8xf32> to vector<128x1xf32>
    %8 = vector.extract_strided_slice %5 {offsets = [0, 2], sizes = [64, 1], strides = [1, 1]} : vector<128x8xf32> to vector<64x1xf32>
    %9 = vector.extract_strided_slice %5 {offsets = [0, 3], sizes = [64, 1], strides = [1, 1]} : vector<128x8xf32> to vector<64x1xf32>
    %10 = vector.extract_strided_slice %5 {offsets = [0, 4], sizes = [1, 1], strides = [1, 1]} : vector<128x8xf32> to vector<1x1xf32>
    %cst = arith.constant dense<0.000000e+00> : vector<64x16xf32>
    %11 = tpu.matmul %2, %1, %cst {dimension_numbers = #tpu.dot_dimension_numbers<[1], [1], [0], [0], [0, 0, 1, 0], [], []>} : vector<64x32xf32>, vector<16x32xf32>, vector<64x16xf32> -> vector<64x16xf32>
    %12 = vector.broadcast %6 : vector<64x1xf32> to vector<64x16xf32>
    %13 = arith.addf %11, %12 : vector<64x16xf32>
    %cst_11 = arith.constant 0.000000e+00 : f32
    %14 = vector.broadcast %cst_11 : f32 to vector<64x16xf32>
    %15 = arith.maximumf %13, %14 : vector<64x16xf32>
    %cst_12 = arith.constant dense<0.000000e+00> : vector<128x16xf32>
    %16 = tpu.matmul %3, %15, %cst_12 {dimension_numbers = #tpu.dot_dimension_numbers<[1], [0], [0], [1], [0, 0, 1, 1], [], []>} : vector<128x64xf32>, vector<64x16xf32>, vector<128x16xf32> -> vector<128x16xf32>
    %17 = vector.broadcast %7 : vector<128x1xf32> to vector<128x16xf32>
    %18 = arith.addf %16, %17 : vector<128x16xf32>
    %19 = math.tanh %18 : vector<128x16xf32>
    %cst_13 = arith.constant dense<0.000000e+00> : vector<64x16xf32>
    %20 = tpu.matmul %4, %0, %cst_13 {dimension_numbers = #tpu.dot_dimension_numbers<[1], [1], [0], [0], [0, 0, 1, 0], [], []>} : vector<64x128xf32>, vector<16x128xf32>, vector<64x16xf32> -> vector<64x16xf32>
    %21 = vector.broadcast %8 : vector<64x1xf32> to vector<64x16xf32>
    %22 = arith.addf %20, %21 : vector<64x16xf32>
    %cst_14 = arith.constant 0.000000e+00 : f32
    %23 = vector.broadcast %cst_14 : f32 to vector<64x16xf32>
    %24 = arith.maximumf %22, %23 : vector<64x16xf32>
    %25 = vector.broadcast %9 : vector<64x1xf32> to vector<64x16xf32>
    %26 = arith.mulf %24, %25 : vector<64x16xf32>
    %cst_15 = arith.constant dense<0.000000e+00> : vector<16xf32>
    %27 = vector.multi_reduction <add>, %26, %cst_15 [0] : vector<64x16xf32> to vector<16xf32>
    %28 = vector.shape_cast %27 : vector<16xf32> to vector<1x16xf32>
    %29 = vector.broadcast %10 : vector<1x1xf32> to vector<1x16xf32>
    %30 = arith.addf %28, %29 : vector<1x16xf32>
    %cst_16 = arith.constant dense<0.000000e+00> : vector<64x16xf32>
    %31 = tpu.matmul %4, %19, %cst_16 {dimension_numbers = #tpu.dot_dimension_numbers<[1], [0], [0], [1], [0, 0, 1, 1], [], []>} : vector<64x128xf32>, vector<128x16xf32>, vector<64x16xf32> -> vector<64x16xf32>
    %32 = vector.broadcast %8 : vector<64x1xf32> to vector<64x16xf32>
    %33 = arith.addf %31, %32 : vector<64x16xf32>
    %cst_17 = arith.constant 0.000000e+00 : f32
    %34 = vector.broadcast %cst_17 : f32 to vector<64x16xf32>
    %35 = arith.maximumf %33, %34 : vector<64x16xf32>
    %36 = vector.broadcast %9 : vector<64x1xf32> to vector<64x16xf32>
    %37 = arith.mulf %35, %36 : vector<64x16xf32>
    %cst_18 = arith.constant dense<0.000000e+00> : vector<16xf32>
    %38 = vector.multi_reduction <add>, %37, %cst_18 [0] : vector<64x16xf32> to vector<16xf32>
    %39 = vector.shape_cast %38 : vector<16xf32> to vector<1x16xf32>
    %40 = vector.broadcast %10 : vector<1x1xf32> to vector<1x16xf32>
    %41 = arith.addf %39, %40 : vector<1x16xf32>
    %cst_19 = arith.constant 0.000000e+00 : f32
    %42 = vector.broadcast %cst_19 : f32 to vector<1x16xf32>
    %43 = arith.subf %42, %30 : vector<1x16xf32>
    %cst_20 = arith.constant 0.000000e+00 : f32
    %44 = vector.broadcast %cst_20 : f32 to vector<1x16xf32>
    %45 = arith.maximumf %43, %44 : vector<1x16xf32>
    %46 = math.absf %43 : vector<1x16xf32>
    %cst_21 = arith.constant 0.000000e+00 : f32
    %47 = vector.broadcast %cst_21 : f32 to vector<1x16xf32>
    %48 = arith.subf %47, %46 : vector<1x16xf32>
    %49 = math.exp %48 : vector<1x16xf32>
    %cst_22 = arith.constant 1.000000e+00 : f32
    %50 = vector.broadcast %cst_22 : f32 to vector<1x16xf32>
    %51 = arith.addf %50, %49 : vector<1x16xf32>
    %52 = math.log %51 : vector<1x16xf32>
    %53 = arith.addf %45, %52 : vector<1x16xf32>
    %cst_23 = arith.constant 0.000000e+00 : f32
    %54 = vector.broadcast %cst_23 : f32 to vector<1x16xf32>
    %55 = arith.maximumf %41, %54 : vector<1x16xf32>
    %56 = math.absf %41 : vector<1x16xf32>
    %cst_24 = arith.constant 0.000000e+00 : f32
    %57 = vector.broadcast %cst_24 : f32 to vector<1x16xf32>
    %58 = arith.subf %57, %56 : vector<1x16xf32>
    %59 = math.exp %58 : vector<1x16xf32>
    %cst_25 = arith.constant 1.000000e+00 : f32
    %60 = vector.broadcast %cst_25 : f32 to vector<1x16xf32>
    %61 = arith.addf %60, %59 : vector<1x16xf32>
    %62 = math.log %61 : vector<1x16xf32>
    %63 = arith.addf %55, %62 : vector<1x16xf32>
    %64 = arith.addf %53, %63 : vector<1x16xf32>
    %c0_26 = arith.constant 0 : index
    %c0_27 = arith.constant 0 : index
    %65 = vector.load %arg7[%c0_26, %c0_27] : memref<1x16xf32, #tpu.memory_space<vmem>>, vector<1x16xf32>
    tpu.vector_store %arg7[%c0_26, %c0_27], %64 {strides = array<i32>} : memref<1x16xf32, #tpu.memory_space<vmem>>, vector<1x16xf32>,
    return
  }
  func.func @transform_0(%arg0: i32) -> (i32, i32) {
    %c0_i32 = arith.constant 0 : i32
    %c0_i32_0 = arith.constant 0 : i32
    return %arg0, %c0_i32 : i32, i32
  }
  func.func @transform_1(%arg0: i32) -> (i32, i32) {
    %c0_i32 = arith.constant 0 : i32
    %c0_i32_0 = arith.constant 0 : i32
    return %arg0, %c0_i32 : i32, i32
  }
  func.func @transform_2(%arg0: i32) -> (i32, i32) {
    %c0_i32 = arith.constant 0 : i32
    %c0_i32_0 = arith.constant 0 : i32
    %c0_i32_1 = arith.constant 0 : i32
    return %c0_i32, %c0_i32_0 : i32, i32
  }
  func.func @transform_3(%arg0: i32) -> (i32, i32) {
    %c0_i32 = arith.constant 0 : i32
    %c0_i32_0 = arith.constant 0 : i32
    %c0_i32_1 = arith.constant 0 : i32
    return %c0_i32, %c0_i32_0 : i32, i32
  }
  func.func @transform_4(%arg0: i32) -> (i32, i32) {
    %c0_i32 = arith.constant 0 : i32
    %c0_i32_0 = arith.constant 0 : i32
    %c0_i32_1 = arith.constant 0 : i32
    return %c0_i32, %c0_i32_0 : i32, i32
  }
  func.func @transform_5(%arg0: i32) -> (i32, i32) {
    %c0_i32 = arith.constant 0 : i32
    %c0_i32_0 = arith.constant 0 : i32
    %c0_i32_1 = arith.constant 0 : i32
    return %c0_i32, %c0_i32_0 : i32, i32
  }
  func.func @transform_6(%arg0: i32) -> (i32, i32) {
    %c0_i32 = arith.constant 0 : i32
    %c0_i32_0 = arith.constant 0 : i32
    return %c0_i32, %arg0 : i32, i32
  }
}

</mosaic_0001>

<bundles_post_ra>
// kernel: tpu_custom_call.1
= control target key start
LH: loop header
LB: loop body
LE: loop exit
PB: predicated region body
PF: predicated region fallthrough
CT: control target
= control target key end

     0   :  { %vm116_vm0 = vcmask 261120   ;;  %v790_v3 = vmov 0   ;;  %s1172_s0 = inlined_call_operand.vmem [shape: f32[16,128], index: 0, kind: input, shape index: {}]   ;;  %s1173_s1 = inlined_call_operand.vmem [shape: f32[16,32], index: 1, kind: input, shape index: {}]   ;;  %s1174_s2 = inlined_call_operand.vmem [shape: f32[64,32], index: 2, kind: input, shape index: {}]   ;;  %s1175_s3 = inlined_call_operand.vmem [shape: f32[128,64], index: 3, kind: input, shape index: {}]   ;;  %s1176_s4 = inlined_call_operand.vmem [shape: f32[64,128], index: 4, kind: input, shape index: {}]   ;;  %s1177_s5 = inlined_call_operand.vmem [shape: f32[128,8], index: 5, kind: input, shape index: {}]   ;;  %s1178_s6 = inlined_call_operand.hbm [shape: f32[1,16], index: 6, kind: output, shape index: {}]  }
   0x1   :  { %v27_v0 = vld [vmem:[%s1173_s1 + $0x8] sm:$0xff]  ;;  %v844_v2 = vld [vmem:[%s1177_s5 + $0x38] sm:$0xff]  ;;  %706 = vset.pattern.permute.xlu1 %v790_v3  ;;  %v26_v4 = vld [vmem:[%s1173_s1] sm:$0xff]  ;;  %705 = vset.pattern.permute.xlu0 %v790_v3 }
   0x2   :  { %v837_v1 = vld [vmem:[%s1177_s5 + $0x28] sm:$0xff]  ;;  %663 = vmatpush.xpose.msk.msra.mxu0 %vm116_vm0, %v27_v0  ;;  %689 = vmatpush.xpose.msk.msra.mxu2 %vm116_vm0, %v27_v0  ;;  %v28_v5 = vld [vmem:[%s1174_s2] sm:$0xff] }
   0x3   :  { %103 = vperm.xlu1 %706, %v837_v1   ;;  %113 = vperm.xlu0 %705, %v844_v2   ;;  %v33_v6 = vld [vmem:[%s1174_s2 + $0x28] sm:$0xff] }
   0x4   :  { %707 = vset.pattern.permute.xlu2 %v790_v3 }
   0x6   :  { %664 = vmatpush.xpose.msk.msra.mxu0 %vm116_vm0, %v26_v4  ;;  %690 = vmatpush.xpose.msk.msra.mxu2 %vm116_vm0, %v26_v4 }
   0x7   :  { %11 = vsyncpa [#allocation3], 0  ;;  %v864_v7 = vld [vmem:[%s1177_s5 + $0x20] sm:$0xff]  ;;  %v869_v8 = vld [vmem:[%s1177_s5 + $0x30] sm:$0xff]  ;;  %v791_v23 = vmov 1   ;;  %vm268_vm1 = vcmask 523264  }
   0x8   :  { %v874_v9 = vld [vmem:[%s1177_s5 + $0x18] sm:$0xff]  ;;  %v29_v10 = vld [vmem:[%s1174_s2 + $0x8] sm:$0xff]  ;;  %v34_v11 = vld [vmem:[%s1174_s2 + $0x30] sm:$0xff]  ;;  %vm519_vm2 = vcmask 130048   ;;  %s654_s21 = sshll.u32 %s1178_s6, 4  ;;  %vm645_vm3 = vcmask 122880   ;;  %s655_s21 = int_to_ptr.hbm [resolvable:$true] %s654_s21 }
   0x9   :  { %665 = vmatmul.msk.f32.vlgmr.msra.gmra.mxu0 %vm116_vm0, %v28_v5  ;;  %670 = vmatmul.msk.f32.vlgmr.msra.gmra.mxu2 %vm116_vm0, %v33_v6  ;;  %v888_v12 = vld [vmem:[%s1177_s5 + $0x10] sm:$0xff]  ;;  %v895_v13 = vld [vmem:[%s1177_s5] sm:$0xff]  ;;  %v900_v14 = vld [vmem:[%s1177_s5 + $0x8] sm:$0xff] }
   0xa   :  { %93 = vperm.xlu2 %707, %v874_v9   ;;  %v30_v15 = vld [vmem:[%s1174_s2 + $0x10] sm:$0xff]  ;;  %v35_v16 = vld [vmem:[%s1174_s2 + $0x38] sm:$0xff]  ;;  %v32_v18 = vld [vmem:[%s1174_s2 + $0x20] sm:$0xff] }
   0xb   :  { %98 = vperm.xlu1 %706, %v864_v7   ;;  %108 = vperm.xlu0 %705, %v869_v8   ;;  %v31_v17 = vld [vmem:[%s1174_s2 + $0x18] sm:$0xff]  ;;  %v74_v21 = vld [vmem:[%s1177_s5 + $0x70] sm:$0xff]  ;;  %v69_v26 = vld [vmem:[%s1177_s5 + $0x48] sm:$0xff] }
   0xc   :  { %v73_v32 = vld [vmem:[%s1177_s5 + $0x68] sm:$0xff]  ;;  %v75_v41 = vld [vmem:[%s1177_s5 + $0x78] sm:$0xff]  ;;  %v72_v53 = vld [vmem:[%s1177_s5 + $0x60] sm:$0xff] }
   0xd   :  { %v71_v42 = vld [vmem:[%s1177_s5 + $0x58] sm:$0xff]  ;;  %v68_v54 = vld [vmem:[%s1177_s5 + $0x40] sm:$0xff]  ;;  %v42_v59 = vld [vmem:[%s1175_s3 + $0x30] sm:$0xff] }
   0xe   :  { %v36_v60 = vld [vmem:[%s1175_s3] sm:$0xff]  ;;  %v70_v61 = vld [vmem:[%s1177_s5 + $0x50] sm:$0xff]  ;;  %v43_v62 = vld [vmem:[%s1175_s3 + $0x38] sm:$0xff] }
   0xf   :  { %v37_v63 = vld [vmem:[%s1175_s3 + $0x8] sm:$0xff]  ;;  %v44_v0 = vld [vmem:[%s1175_s3 + $0x40] sm:$0xff]  ;;  %v38_v3 = vld [vmem:[%s1175_s3 + $0x10] sm:$0xff] }
  0x10   :  { %v45_v4 = vld [vmem:[%s1175_s3 + $0x48] sm:$0xff]  ;;  %v39_v5 = vld [vmem:[%s1175_s3 + $0x18] sm:$0xff]  ;;  %v46_v6 = vld [vmem:[%s1175_s3 + $0x50] sm:$0xff] }
  0x11   :  { %666 = vmatmul.msk.f32.gmra.mxu0 %vm116_vm0, %v29_v10  ;;  %671 = vmatmul.msk.f32.gmra.mxu2 %vm116_vm0, %v34_v11  ;;  %v40_v10 = vld [vmem:[%s1175_s3 + $0x20] sm:$0xff]  ;;  %v47_v11 = vld [vmem:[%s1175_s3 + $0x58] sm:$0xff] }
  0x12   :  { %88 = vperm.xlu2 %707, %v888_v12  }
  0x13   :  { %78 = vperm.xlu1 %706, %v895_v13   ;;  %83 = vperm.xlu0 %705, %v900_v14  }
  0x19   :  { %667 = vmatmul.msk.f32.gmra.mxu0 %vm116_vm0, %v30_v15  ;;  %672 = vmatmul.msk.f32.gmra.mxu2 %vm116_vm0, %v35_v16  ;;  %v41_v15 = vld [vmem:[%s1175_s3 + $0x28] sm:$0xff]  ;;  %v48_v16 = vld [vmem:[%s1175_s3 + $0x60] sm:$0xff] }
  0x1a   :  { %708 = vset.pattern.permute.xlu2 %v791_v23 }
  0x1b   :  { %709 = vset.pattern.permute.xlu0 %v791_v23  ;;  %710 = vset.pattern.permute.xlu1 %v791_v23  ;;  %v1028_v23 = vld [vmem:[%s1176_s4] sm:$0xff] }
  0x1c   :  { %260 = vperm.xlu0 %709, %v74_v21   ;;  %255 = vperm.xlu1 %710, %v73_v32   ;;  %v1061_v32 = vld [vmem:[%s1176_s4 + $0x20] sm:$0xff] }
  0x1d   :  { %265 = vperm.xlu2 %708, %v75_v41  }
  0x21   :  { %668 = vmatmul.msk.f32.gmra.mxu0 %vm116_vm0, %v31_v17  ;;  %v49_v17 = vld [vmem:[%s1175_s3 + $0x68] sm:$0xff] }
  0x24   :  { %235 = vperm.xlu0 %709, %v69_v26   ;;  %245 = vperm.xlu1 %710, %v71_v42  }
  0x25   :  { %250 = vperm.xlu2 %708, %v72_v53  }
  0x29   :  { %669 = vmatmul.msk.f32.gmra.mxu0 %vm116_vm0, %v32_v18  ;;  %v50_v18 = vld [vmem:[%s1175_s3 + $0x70] sm:$0xff] }
  0x2c   :  { %221 = vperm.xlu0 %709, %v869_v8   ;;  %230 = vperm.xlu1 %710, %v68_v54  }
  0x2d   :  { %240 = vperm.xlu2 %708, %v70_v61  }
  0x34   :  { %209 = vperm.xlu0 %709, %v874_v9   ;;  %217 = vperm.xlu1 %710, %v837_v1  }
  0x35   :  { %225 = vperm.xlu2 %708, %v844_v2  }
  0x3c   :  { %197 = vperm.xlu0 %709, %v895_v13   ;;  %205 = vperm.xlu1 %710, %v888_v12  }
  0x3d   :  { %213 = vperm.xlu2 %708, %v864_v7  }
  0x45   :  { %201 = vperm.xlu2 %708, %v900_v14  }
  0x64   :  { %v94_v29 = vpop.permute.xlu2 %93 }
  0x6c   :  { %v89_v43 = vpop.permute.xlu2 %88 }
  0x75   :  { %v114_v24 = vpop.permute.xlu0 %113  ;;  %v104_v27 = vpop.permute.xlu1 %103 }
  0x7d   :  { %v109_v30 = vpop.permute.xlu0 %108  ;;  %v99_v38 = vpop.permute.xlu1 %98 }
  0x85   :  { %v84_v47 = vpop.permute.xlu0 %83  ;;  %v79_v50 = vpop.permute.xlu1 %78 }
  0x86   :  { %v164_v19 = vpop.f32.mrf.mxu0 }
  0x87   :  { %v165_v55 = vadd.f32 %v164_v19, %v79_v50  ;;  %v51_v19 = vld [vmem:[%s1175_s3 + $0x78] sm:$0xff] }
  0x89   :  { %v188_v58 = vmax.f32 %v165_v55, 0.0 }
  0x8c   :  { %v179_v20 = vpop.f32.mrf.mxu2 }
  0x8d   :  { %v180_v36 = vadd.f32 %v179_v20, %v104_v27  ;;  %v25_v20 = vld [vmem:[%s1172_s0 + $0x8] sm:$0xff]  ;;  %v1044_v27 = vld [vmem:[%s1176_s4 + $0x10] sm:$0xff] }
  0x8e   :  { %v167_v22 = vpop.f32.mrf.mxu0  ;;  %444 = vmatpush.xpose.msrb.mxu2 %v25_v20 }
  0x8f   :  { %v193_v40 = vmax.f32 %v180_v36, 0.0  ;;  %v168_v51 = vadd.f32 %v167_v22, %v84_v47  ;;  %v24_v22 = vld [vmem:[%s1172_s0] sm:$0xff]  ;;  %v793_v36 = vmov 3  }
  0x91   :  { %v189_v57 = vmax.f32 %v168_v51, 0.0 }
  0x92   :  { %445 = vmatpush.xpose.msrb.mxu2 %v24_v22 }
  0x94   :  { %v182_v25 = vpop.f32.mrf.mxu2 }
  0x95   :  { %v183_v33 = vadd.f32 %v182_v25, %v109_v30  ;;  %446 = vmatmul.f32.vlgmr.msrb.gmra.mxu2 %v1028_v23  ;;  %v1036_v25 = vld [vmem:[%s1176_s4 + $0x8] sm:$0xff]  ;;  %v792_v30 = vmov 2  }
  0x96   :  { %v170_v28 = vpop.f32.mrf.mxu0  ;;  %711 = vset.pattern.permute.xlu1 %v792_v30  ;;  %713 = vset.pattern.permute.xlu0 %v792_v30 }
  0x97   :  { %v194_v39 = vmax.f32 %v183_v33, 0.0  ;;  %v171_v48 = vadd.f32 %v170_v28, %v89_v43  ;;  %399 = vperm.xlu1 %711, %v895_v13   ;;  %712 = vset.pattern.permute.xlu2 %v792_v30  ;;  %v261_v43 = vpop.permute.xlu0 %260 }
  0x98   :  { %407 = vperm.xlu0 %713, %v888_v12   ;;  %403 = vperm.xlu2 %712, %v900_v14  }
  0x99   :  { %v190_v56 = vmax.f32 %v171_v48, 0.0 }
  0x9c   :  { %v185_v31 = vpop.f32.mrf.mxu2 }
  0x9d   :  { %v186_v34 = vadd.f32 %v185_v31, %v114_v24  ;;  %449 = vmatmul.f32.gmra.mxu2 %v1036_v25 }
  0x9e   :  { %v173_v35 = vpop.f32.mrf.mxu0 }
  0x9f   :  { %v195_v37 = vmax.f32 %v186_v34, 0.0  ;;  %v174_v45 = vadd.f32 %v173_v35, %v94_v29  ;;  %v1052_v29 = vld [vmem:[%s1176_s4 + $0x18] sm:$0xff]  ;;  %411 = vperm.xlu1 %711, %v874_v9   ;;  %v1070_v35 = vld [vmem:[%s1176_s4 + $0x28] sm:$0xff] }
  0xa0   :  { %717 = vset.pattern.permute.xlu0 %v793_v36  ;;  %714 = vset.pattern.permute.xlu2 %v793_v36 }
  0xa1   :  { %325 = vmatpush.msrb.mxu0 %v195_v37  ;;  %691 = vmatpush.msra.mxu1 %v195_v37  ;;  %v191_v52 = vmax.f32 %v174_v45, 0.0  ;;  %v266_v37 = vpop.permute.xlu2 %265 }
  0xa2   :  { %488 = vperm.xlu0 %717, %v888_v12   ;;  %480 = vperm.xlu2 %714, %v895_v13   ;;  %v256_v12 = vpop.permute.xlu1 %255 }
  0xa3   :  { %326 = vmatpush.msrb.mxu0 %v194_v39  ;;  %692 = vmatpush.msra.mxu1 %v194_v39 }
  0xa5   :  { %327 = vmatpush.msrb.mxu0 %v193_v40  ;;  %693 = vmatpush.msra.mxu1 %v193_v40  ;;  %v1081_v40 = vld [vmem:[%s1176_s4 + $0x30] sm:$0xff] }
  0xa6   :  { %v176_v44 = vpop.f32.mrf.mxu0  ;;  %452 = vmatmul.f32.gmra.mxu2 %v1044_v27 }
  0xa7   :  { %v177_v46 = vadd.f32 %v176_v44, %v99_v38  ;;  %715 = vset.pattern.permute.xlu1 %v793_v36  ;;  %v1092_v44 = vld [vmem:[%s1176_s4 + $0x38] sm:$0xff]  ;;  %s795_s4 = smov [#allocation2]  }
  0xa8   :  { %484 = vperm.xlu1 %715, %v900_v14   ;;  %s652_s18 = sshll.u32 %s795_s4, 4  ;;  %s653_s18 = int_to_ptr.vmem [resolvable:$true] %s652_s18 }
  0xa9   :  { %v192_v49 = vmax.f32 %v177_v46, 0.0  ;;  %v251_v41 = vpop.permute.xlu2 %250 }
  0xaa   :  { %720 = vset.pattern.permute.xlu0 %v792_v30  ;;  %716 = vset.pattern.permute.xlu2 %v792_v30  ;;  %v246_v46 = vpop.permute.xlu1 %245 }
  0xab   :  { %328 = vmatpush.msrb.mxu0 %v192_v49  ;;  %694 = vmatpush.msra.mxu1 %v192_v49  ;;  %v236_v49 = vpop.permute.xlu0 %235 }
  0xac   :  { %427 = vperm.xlu0 %720, %v844_v2   ;;  %415 = vperm.xlu2 %716, %v864_v7  }
  0xad   :  { %329 = vmatpush.msrb.mxu0 %v191_v52  ;;  %695 = vmatpush.msra.mxu1 %v191_v52 }
  0xae   :  { %455 = vmatmul.f32.gmra.mxu2 %v1052_v29 }
  0xaf   :  { %330 = vmatpush.msrb.mxu0 %v190_v56  ;;  %696 = vmatpush.msra.mxu1 %v190_v56 }
  0xb0   :  { %718 = vset.pattern.permute.xlu1 %v792_v30 }
  0xb1   :  { %331 = vmatpush.msrb.mxu0 %v189_v57  ;;  %697 = vmatpush.msra.mxu1 %v189_v57  ;;  %v241_v47 = vpop.permute.xlu2 %240 }
  0xb2   :  { %419 = vperm.xlu1 %718, %v837_v1   ;;  %v231_v54 = vpop.permute.xlu1 %230 }
  0xb3   :  { %332 = vmatpush.msrb.mxu0 %v188_v58  ;;  %698 = vmatpush.msra.mxu1 %v188_v58  ;;  %v222_v58 = vpop.permute.xlu0 %221 }
  0xb4   :  { %679 = vmatmul.msk.f32.vlgmr.msra.gmra.mxu1 %vm268_vm1, %v42_v59  ;;  %673 = vmatmul.msk.f32.vlgmr.msrb.gmra.mxu0 %vm268_vm1, %v36_v60 }
  0xb5   :  { %719 = vset.pattern.permute.xlu2 %v793_v36 }
  0xb6   :  { %458 = vmatmul.f32.gmra.mxu2 %v1061_v32  ;;  %492 = vperm.xlu2 %719, %v874_v9  }
  0xb9   :  { %v226_v56 = vpop.permute.xlu2 %225 }
  0xba   :  { %423 = vperm.xlu1 %718, %v869_v8   ;;  %v218_v61 = vpop.permute.xlu1 %217 }
  0xbc   :  { %680 = vmatmul.msk.f32.gmra.mxu1 %vm268_vm1, %v43_v62  ;;  %674 = vmatmul.msk.f32.gmra.mxu0 %vm268_vm1, %v37_v63 }
  0xbe   :  { %461 = vmatmul.f32.gmra.mxu2 %v1070_v35  ;;  %496 = vperm.xlu2 %719, %v864_v7  }
  0xc2   :  { %721 = vset.pattern.permute.xlu1 %v793_v36 }
  0xc3   :  { %500 = vperm.xlu1 %721, %v837_v1  }
  0xc4   :  { %681 = vmatmul.msk.f32.gmra.mxu1 %vm268_vm1, %v44_v0  ;;  %675 = vmatmul.msk.f32.gmra.mxu0 %vm268_vm1, %v38_v3  ;;  %v214_v0 = vpop.permute.xlu2 %213 }
  0xc6   :  { %464 = vmatmul.f32.gmra.mxu2 %v1081_v40  ;;  %504 = vperm.xlu2 %719, %v869_v8  }
  0xcb   :  { %508 = vperm.xlu1 %721, %v844_v2  }
  0xcc   :  { %682 = vmatmul.msk.f32.gmra.mxu1 %vm268_vm1, %v45_v4  ;;  %676 = vmatmul.msk.f32.gmra.mxu0 %vm268_vm1, %v39_v5  ;;  %v210_v4 = vpop.permute.xlu0 %209  ;;  %v202_v20 = vpop.permute.xlu2 %201 }
  0xce   :  { %467 = vmatmul.f32.gmra.mxu2 %v1092_v44 }
  0xd4   :  { %683 = vmatmul.msk.f32.gmra.mxu1 %vm268_vm1, %v46_v6  ;;  %677 = vmatmul.msk.f32.gmra.mxu0 %vm268_vm1, %v40_v10 }
  0xdc   :  { %684 = vmatmul.msk.f32.gmra.mxu1 %vm268_vm1, %v47_v11  ;;  %678 = vmatmul.msk.f32.gmra.mxu0 %vm268_vm1, %v41_v15 }
  0xe4   :  { %685 = vmatmul.msk.f32.gmra.mxu1 %vm268_vm1, %v48_v16 }
  0xec   :  { %686 = vmatmul.msk.f32.gmra.mxu1 %vm268_vm1, %v49_v17  ;;  %v206_v17 = vpop.permute.xlu1 %205 }
  0xf4   :  { %687 = vmatmul.msk.f32.gmra.mxu1 %vm268_vm1, %v50_v18 }
  0xfc   :  { %688 = vmatmul.msk.f32.gmra.mxu1 %vm268_vm1, %v51_v19 }
 0x131   :  { %v1020_v21 = vpop.f32.mrf.mxu1  ;;  %v1064_v33 = vpop.f32.mrf.mxu0 }
 0x132   :  { %v353_v6 = vadd.f32 %v1020_v21, %v222_v58 }
 0x139   :  { %v1031_v24 = vpop.f32.mrf.mxu1  ;;  %v1076_v38 = vpop.f32.mrf.mxu0 }
 0x13a   :  { %v356_v2 = vadd.f32 %v1031_v24, %v226_v56  ;;  %v198_v24 = vpop.permute.xlu0 %197 }
 0x141   :  { %v1039_v26 = vpop.f32.mrf.mxu1  ;;  %v1087_v42 = vpop.f32.mrf.mxu0 }
 0x142   :  { %v359_v63 = vadd.f32 %v1039_v26, %v231_v54  ;;  %v341_v21 = vadd.f32 %v1087_v42, %v206_v17 }
 0x149   :  { %v1047_v28 = vpop.f32.mrf.mxu1  ;;  %v343_v48 = vpop.f32.mrf.mxu0 }
 0x14a   :  { %v362_v7 = vadd.f32 %v1047_v28, %v236_v49  ;;  %v344_v19 = vadd.f32 %v343_v48, %v210_v4  ;;  %v338_v28 = vadd.f32 %v1076_v38, %v202_v20  ;;  %v794_v38 = vmov 4  }
 0x14b   :  { %722 = vset.pattern.permute.xlu2 %v794_v38  ;;  %723 = vset.pattern.permute.xlu0 %v794_v38 }
 0x14c   :  { %542 = vperm.xlu2 %722, %v895_v13  }
 0x151   :  { %v364_v31 = vpop.f32.mrf.mxu1  ;;  %v346_v57 = vpop.f32.mrf.mxu0 }
 0x152   :  { %v365_v60 = vadd.f32 %v364_v31, %v241_v47  ;;  %v347_v16 = vadd.f32 %v346_v57, %v214_v0  ;;  %v335_v31 = vadd.f32 %v1064_v33, %v198_v24 }
 0x159   :  { %v367_v34 = vpop.f32.mrf.mxu1  ;;  %v349_v5 = vpop.f32.mrf.mxu0 }
 0x15a   :  { %v368_v9 = vadd.f32 %v367_v34, %v246_v46  ;;  %v350_v11 = vadd.f32 %v349_v5, %v218_v61 }
 0x161   :  { %v370_v39 = vpop.f32.mrf.mxu1 }
 0x162   :  { %v371_v55 = vadd.f32 %v370_v39, %v251_v41  ;;  %v1119_v41 = vpop.permute.xlu2 %403 }
 0x169   :  { %v373_v14 = vpop.f32.mrf.mxu1 }
 0x16a   :  { %v374_v53 = vadd.f32 %v373_v14, %v256_v12  ;;  %v1123_v42 = vpop.permute.xlu2 %480 }
 0x171   :  { %v376_v45 = vpop.f32.mrf.mxu1 }
 0x172   :  { %v377_v51 = vadd.f32 %v376_v45, %v261_v43  ;;  %v408_v45 = vpop.permute.xlu0 %407 }
 0x179   :  { %v379_v50 = vpop.f32.mrf.mxu1 }
 0x17a   :  { %v380_v52 = vadd.f32 %v379_v50, %v266_v37 }
 0x17c   :  { %724 = vtanh.f32 %v380_v52 }
 0x17d   :  { %726 = vtanh.f32 %v377_v51 }
 0x17e   :  { %728 = vtanh.f32 %v374_v53 }
 0x17f   :  { %730 = vtanh.f32 %v371_v55 }
 0x180   :  { %732 = vtanh.f32 %v368_v9  ;;  %v489_v9 = vpop.permute.xlu0 %488 }
 0x181   :  { %734 = vtanh.f32 %v365_v60 }
 0x182   :  { %v725_v59 = vpop.eup %724  ;;  %736 = vtanh.f32 %v362_v7 }
 0x183   :  { %546 = vmatpush.msra.mxu3 %v725_v59  ;;  %v727_v1 = vpop.eup %726  ;;  %738 = vtanh.f32 %v359_v63 }
 0x184   :  { %v729_v62 = vpop.eup %728  ;;  %740 = vtanh.f32 %v356_v2 }
 0x185   :  { %547 = vmatpush.msra.mxu3 %v727_v1  ;;  %v731_v3 = vpop.eup %730  ;;  %742 = vtanh.f32 %v353_v6 }
 0x186   :  { %v733_v8 = vpop.eup %732  ;;  %744 = vtanh.f32 %v350_v11 }
 0x187   :  { %548 = vmatpush.msra.mxu3 %v729_v62  ;;  %v735_v10 = vpop.eup %734  ;;  %746 = vtanh.f32 %v347_v16 }
 0x188   :  { %v737_v15 = vpop.eup %736  ;;  %748 = vtanh.f32 %v344_v19  ;;  %v428_v16 = vpop.permute.xlu0 %427 }
 0x189   :  { %549 = vmatpush.msra.mxu3 %v731_v3  ;;  %v739_v18 = vpop.eup %738  ;;  %750 = vtanh.f32 %v341_v21 }
 0x18a   :  { %v741_v22 = vpop.eup %740  ;;  %752 = vtanh.f32 %v338_v28 }
 0x18b   :  { %550 = vmatpush.msra.mxu3 %v733_v8  ;;  %v743_v26 = vpop.eup %742  ;;  %754 = vtanh.f32 %v335_v31 }
 0x18c   :  { %v745_v30 = vpop.eup %744 }
 0x18d   :  { %551 = vmatpush.msra.mxu3 %v735_v10  ;;  %v747_v34 = vpop.eup %746 }
 0x18e   :  { %v749_v36 = vpop.eup %748 }
 0x18f   :  { %552 = vmatpush.msra.mxu3 %v737_v15  ;;  %v751_v37 = vpop.eup %750 }
 0x190   :  { %v753_v39 = vpop.eup %752 }
 0x191   :  { %553 = vmatpush.msra.mxu3 %v739_v18  ;;  %v755_v12 = vpop.eup %754 }
 0x193   :  { %554 = vmatpush.msra.mxu3 %v741_v22 }
 0x195   :  { %555 = vmatpush.msra.mxu3 %v743_v26 }
 0x197   :  { %556 = vmatpush.msra.mxu3 %v745_v30 }
 0x199   :  { %557 = vmatpush.msra.mxu3 %v747_v34 }
 0x19b   :  { %558 = vmatpush.msra.mxu3 %v749_v36 }
 0x19d   :  { %559 = vmatpush.msra.mxu3 %v751_v37 }
 0x19f   :  { %560 = vmatpush.msra.mxu3 %v753_v39 }
 0x1a1   :  { %561 = vmatpush.msra.mxu3 %v755_v12 }
 0x1a2   :  { %562 = vmatmul.f32.vlgmr.msra.gmra.mxu3 %v1028_v23  ;;  %v447_v23 = vpop.f32.mrf.mxu2 }
 0x1aa   :  { %565 = vmatmul.f32.gmra.mxu3 %v1036_v25  ;;  %v450_v33 = vpop.f32.mrf.mxu2  ;;  %v1117_v25 = vpop.permute.xlu1 %399 }
 0x1b2   :  { %568 = vmatmul.f32.gmra.mxu3 %v1044_v27  ;;  %v453_v14 = vpop.f32.mrf.mxu2  ;;  %v1121_v13 = vpop.permute.xlu1 %411 }
 0x1b3   :  { %v454_v49 = vadd.f32 %v453_v14, %v408_v45 }
 0x1b5   :  { %v473_v54 = vmax.f32 %v454_v49, 0.0 }
 0x1b7   :  { %v513_v7 = vmul.f32 %v489_v9, %v473_v54 }
 0x1b9   :  { %v523_v2 = vsel %vm519_vm2, %v513_v7, 0.0 }
 0x1ba   :  { %571 = vmatmul.f32.gmra.mxu3 %v1052_v29  ;;  %v456_v27 = vpop.f32.mrf.mxu2  ;;  %v1125_v29 = vpop.permute.xlu1 %484 }
 0x1bb   :  { %v457_v52 = vadd.f32 %v456_v27, %v1121_v13 }
 0x1bd   :  { %v474_v59 = vmax.f32 %v457_v52, 0.0 }
 0x1c2   :  { %574 = vmatmul.f32.gmra.mxu3 %v1061_v32  ;;  %v459_v32 = vpop.f32.mrf.mxu2  ;;  %v1130_v43 = vpop.permute.xlu1 %419 }
 0x1ca   :  { %577 = vmatmul.f32.gmra.mxu3 %v1070_v35  ;;  %v1127_v35 = vpop.permute.xlu2 %415  ;;  %v462_v46 = vpop.f32.mrf.mxu2 }
 0x1cb   :  { %v1138_v55 = vpop.permute.xlu1 %423  ;;  %v460_v1 = vadd.f32 %v459_v32, %v1127_v35  ;;  %v463_v0 = vadd.f32 %v462_v46, %v1130_v43 }
 0x1cd   :  { %v475_v63 = vmax.f32 %v460_v1, 0.0  ;;  %v476_v6 = vmax.f32 %v463_v0, 0.0 }
 0x1d2   :  { %580 = vmatmul.f32.gmra.mxu3 %v1081_v40  ;;  %v448_v40 = vadd.f32 %v447_v23, %v1117_v25  ;;  %v1133_v50 = vpop.permute.xlu2 %492  ;;  %v465_v58 = vpop.f32.mrf.mxu2 }
 0x1d3   :  { %v514_v3 = vmul.f32 %v1133_v50, %v474_v59  ;;  %v501_v8 = vpop.permute.xlu1 %500  ;;  %v466_v11 = vadd.f32 %v465_v58, %v1138_v55 }
 0x1d4   :  { %v471_v47 = vmax.f32 %v448_v40, 0.0  ;;  %v516_v22 = vmul.f32 %v501_v8, %v476_v6 }
 0x1d5   :  { %v525_v10 = vsel %vm519_vm2, %v514_v3, 0.0  ;;  %v477_v19 = vmax.f32 %v466_v11, 0.0 }
 0x1d6   :  { %v511_v51 = vmul.f32 %v1123_v42, %v471_v47  ;;  %v529_v30 = vsel %vm519_vm2, %v516_v22, 0.0 }
 0x1d8   :  { %v520_v57 = vsel %vm519_vm2, %v511_v51, 0.0 }
 0x1da   :  { %583 = vmatmul.f32.gmra.mxu3 %v1092_v44  ;;  %v451_v44 = vadd.f32 %v450_v33, %v1119_v41  ;;  %v497_v62 = vpop.permute.xlu2 %496  ;;  %v468_v17 = vpop.f32.mrf.mxu2 }
 0x1db   :  { %v515_v15 = vmul.f32 %v497_v62, %v475_v63  ;;  %v469_v21 = vadd.f32 %v468_v17, %v428_v16  ;;  %v509_v36 = vpop.permute.xlu1 %508 }
 0x1dc   :  { %v472_v48 = vmax.f32 %v451_v44, 0.0 }
 0x1dd   :  { %v527_v20 = vsel %vm519_vm2, %v515_v15, 0.0  ;;  %v478_v31 = vmax.f32 %v469_v21, 0.0 }
 0x1de   :  { %v512_v53 = vmul.f32 %v1125_v29, %v472_v48 }
 0x1df   :  { %v518_v12 = vmul.f32 %v509_v36, %v478_v31 }
 0x1e0   :  { %v521_v60 = vsel %vm519_vm2, %v512_v53, 0.0 }
 0x1e1   :  { %v522_v61 = vadd.f32 %v521_v60, %v520_v57  ;;  %v533_v33 = vsel %vm519_vm2, %v518_v12, 0.0 }
 0x1e2   :  { %v505_v24 = vpop.permute.xlu2 %504 }
 0x1e3   :  { %v524_v5 = vadd.f32 %v523_v2, %v522_v61  ;;  %v517_v34 = vmul.f32 %v505_v24, %v477_v19 }
 0x1e5   :  { %v526_v18 = vadd.f32 %v525_v10, %v524_v5  ;;  %v531_v39 = vsel %vm519_vm2, %v517_v34, 0.0 }
 0x1e7   :  { %v528_v28 = vadd.f32 %v527_v20, %v526_v18 }
 0x1e9   :  { %v530_v37 = vadd.f32 %v529_v30, %v528_v28 }
 0x1ea   :  { %v543_v6 = vpop.permute.xlu2 %542 }
 0x1eb   :  { %v532_v23 = vadd.f32 %v531_v39, %v530_v37 }
 0x1ed   :  { %v534_v14 = vadd.f32 %v533_v33, %v532_v23 }
 0x1ef   :  { %v535_v32 = vrot.slane %v534_v14, 4 }
 0x1f1   :  { %v536_v44 = vadd.f32 %v535_v32, %v534_v14 }
 0x1f3   :  { %v537_v52 = vrot.slane %v536_v44, 2 }
 0x1f5   :  { %v538_v1 = vadd.f32 %v537_v52, %v536_v44 }
 0x1f7   :  { %v539_v0 = vrot.slane %v538_v1, 1 }
 0x225   :  { %v563_v56 = vpop.f32.mrf.mxu3 }
 0x226   :  { %v564_v46 = vadd.f32 %v563_v56, %v1117_v25 }
 0x228   :  { %v587_v53 = vmax.f32 %v564_v46, 0.0 }
 0x22d   :  { %v566_v4 = vpop.f32.mrf.mxu3 }
 0x22e   :  { %v567_v40 = vadd.f32 %v566_v4, %v1119_v41  ;;  %v595_v41 = vmul.f32 %v587_v53, %v1123_v42  ;;  %v540_v4 = vadd.f32 %v539_v0, %v538_v1 }
 0x230   :  { %v588_v49 = vmax.f32 %v567_v40, 0.0  ;;  %v545_v18 = vadd.f32 %v543_v6, %v540_v4 }
 0x232   :  { %v596_v58 = vmul.f32 %v588_v49, %v1125_v29 }
 0x234   :  { %v604_v56 = vsel %vm519_vm2, %v596_v58, 0.0 }
 0x235   :  { %v569_v26 = vpop.f32.mrf.mxu3 }
 0x236   :  { %v570_v47 = vadd.f32 %v569_v26, %v408_v45  ;;  %v625_v26 = vsub.f32 0.0, %v545_v18 }
 0x238   :  { %v589_v54 = vmax.f32 %v570_v47, 0.0  ;;  %v627_v31 = vand.u32 2147483647, %v625_v26 }
 0x23a   :  { %v597_v7 = vmul.f32 %v589_v54, %v489_v9  ;;  %v628_v37 = vsub.f32 0.0, %v627_v31 }
 0x23c   :  { %v606_v29 = vsel %vm519_vm2, %v597_v7, 0.0 }
 0x23d   :  { %v572_v38 = vpop.f32.mrf.mxu3 }
 0x23e   :  { %v573_v51 = vadd.f32 %v572_v38, %v1121_v13  ;;  %v629_v38 = vmul.f32 1.442695, %v628_v37 }
 0x240   :  { %v590_v59 = vmax.f32 %v573_v51, 0.0  ;;  %756 = vpow2.f32 %v629_v38 }
 0x242   :  { %v598_v13 = vmul.f32 %v590_v59, %v1133_v50 }
 0x244   :  { %v608_v42 = vsel %vm519_vm2, %v598_v13, 0.0 }
 0x245   :  { %v575_v27 = vpop.f32.mrf.mxu3 }
 0x246   :  { %v576_v57 = vadd.f32 %v575_v27, %v1127_v35  ;;  %v603_v35 = vsel %vm519_vm2, %v595_v41, 0.0  ;;  %v757_v32 = vpop.eup %756 }
 0x247   :  { %v605_v2 = vadd.f32 %v604_v56, %v603_v35  ;;  %v631_v40 = vadd.f32 1.0, %v757_v32 }
 0x248   :  { %v591_v25 = vmax.f32 %v576_v57, 0.0 }
 0x249   :  { %v607_v5 = vadd.f32 %v606_v29, %v605_v2 }
 0x24a   :  { %v599_v3 = vmul.f32 %v591_v25, %v497_v62 }
 0x24b   :  { %v609_v11 = vadd.f32 %v608_v42, %v607_v5 }
 0x24c   :  { %v610_v10 = vsel %vm519_vm2, %v599_v3, 0.0 }
 0x24d   :  { %v578_v48 = vpop.f32.mrf.mxu3  ;;  %v611_v19 = vadd.f32 %v610_v10, %v609_v11 }
 0x24e   :  { %v579_v60 = vadd.f32 %v578_v48, %v1130_v43  ;;  %v626_v48 = vmax.f32 %v625_v26, 0.0 }
 0x250   :  { %v592_v61 = vmax.f32 %v579_v60, 0.0 }
 0x252   :  { %v600_v9 = vmul.f32 %v592_v61, %v501_v8 }
 0x255   :  { %v581_v45 = vpop.f32.mrf.mxu3 }
 0x256   :  { %v582_v63 = vadd.f32 %v581_v45, %v1138_v55  ;;  %v612_v55 = vsel %vm519_vm2, %v600_v9, 0.0 }
 0x257   :  { %v613_v22 = vadd.f32 %v612_v55, %v611_v19 }
 0x258   :  { %v593_v43 = vmax.f32 %v582_v63, 0.0 }
 0x25a   :  { %v601_v50 = vmul.f32 %v593_v43, %v505_v24 }
 0x25c   :  { %v614_v62 = vsel %vm519_vm2, %v601_v50, 0.0 }
 0x25d   :  { %v584_v15 = vpop.f32.mrf.mxu3  ;;  %v615_v8 = vadd.f32 %v614_v62, %v613_v22 }
 0x25e   :  { %v585_v17 = vadd.f32 %v584_v15, %v428_v16 }
 0x260   :  { %v594_v20 = vmax.f32 %v585_v17, 0.0 }
 0x262   :  { %v602_v21 = vmul.f32 %v594_v20, %v509_v36 }
 0x264   :  { %v616_v28 = vsel %vm519_vm2, %v602_v21, 0.0 }
 0x265   :  { %v617_v30 = vadd.f32 %v616_v28, %v615_v8 }
 0x267   :  { %v618_v34 = vrot.slane %v617_v30, 4 }
 0x269   :  { %v619_v24 = vadd.f32 %v618_v34, %v617_v30 }
 0x26b   :  { %v620_v39 = vrot.slane %v619_v24, 2 }
 0x26d   :  { %v621_v12 = vadd.f32 %v620_v39, %v619_v24 }
 0x26f   :  { %v622_v16 = vrot.slane %v621_v12, 1 }
 0x271   :  { %v623_v23 = vadd.f32 %v622_v16, %v621_v12 }
 0x273   :  { %v624_v33 = vadd.f32 %v623_v23, %v543_v6 }
 0x275   :  { %v636_v14 = vand.u32 2147483647, %v624_v33  ;;  %v635_v52 = vmax.f32 %v624_v33, 0.0 }
 0x277   :  { %v637_v27 = vsub.f32 0.0, %v636_v14 }
 0x279   :  { %v638_v36 = vmul.f32 1.442695, %v637_v27 }
 0x27b   :  { %758 = vpow2.f32 %v638_v36 }
 0x27c   :  { %760 = vlog2.f32 %v631_v40 }
 0x281   :  { %v759_v44 = vpop.eup %758 }
 0x282   :  { %v640_v46 = vadd.f32 1.0, %v759_v44  ;;  %v761_v47 = vpop.eup %760 }
 0x283   :  { %v633_v49 = vmul.f32 0.6931472, %v761_v47 }
 0x284   :  { %762 = vlog2.f32 %v640_v46 }
 0x285   :  { %v634_v54 = vadd.f32 %v633_v49, %v626_v48 }
 0x28a   :  { %v763_v51 = vpop.eup %762 }
 0x28b   :  { %v642_v53 = vmul.f32 0.6931472, %v763_v51 }
 0x28d   :  { %v643_v57 = vadd.f32 %v642_v53, %v635_v52 }
 0x28f   :  { %v644_v58 = vadd.f32 %v643_v57, %v634_v54 }
 0x291   :  { %646 = vst.msk [vmem:[#allocation2] sm:$0x1] %vm645_vm3, %v644_v58 }
 0x292   :  { %657 = dma.vmem_to_hbm [thread:$0]  %s653_s18, 16, %s655_s21, [#allocation3]  }
 0x293   :  { %788 = dma.done.wait [#allocation3], 16  }
 0x294   :  { %789 = vsyncadd [#allocation3], 4294967280 }
 0x295   :  { %662 = vsyncpa [#allocation3], 1 }

</bundles_post_ra>
